<compile_context>
chip_gen: v5e
topology: v5e:2x2
jax: 0.10.0
libtpu: 0.0.40
codegen_flags: <defaults>
</compile_context>

<pallas_src>
import functools

import jax
import jax.numpy as jnp
from jax import lax
from jax.experimental import pallas as pl
from jax.experimental.pallas import tpu as pltpu


def _l1_depth_loss_kernel(pred_ref, label_ref, len_ref,
                          loss_part_ref, sents_part_ref,
                          *, mask_value: float, batch_size: int,
                          block_rows: int):
    i = pl.program_id(0)

    # Upcast on the VMEM tile (inputs may be bf16 in HBM; accumulate in f32).
    pred = pred_ref[...].astype(jnp.float32)       # (TB, S)
    lab = label_ref[...].astype(jnp.float32)       # (TB, S)
    lengths = len_ref[...]                         # (TB, 1) f32

    # Rows of the (possibly ragged) last tile that fall outside the real batch
    # are excluded via select so out-of-bounds garbage can never contribute.
    row_idx = i * block_rows + lax.broadcasted_iota(
        jnp.int32, (block_rows, 1), 0)
    row_valid = row_idx < batch_size               # (TB, 1) bool

    # Fused masking: (pred*m - lab*m) == (pred - lab) * m.
    abs_diff = jnp.where(lab > mask_value, jnp.abs(pred - lab),
                         jnp.float32(0.0))         # (TB, S)
    loss_per_sent = jnp.sum(abs_diff, axis=1, keepdims=True)      # (TB, 1)

    # Real zero-length rows keep the reference divide-by-zero semantics;
    # invalid (out-of-bounds) rows are selected away before the sum.
    normalized = jnp.where(row_valid, loss_per_sent / lengths,
                           jnp.float32(0.0))       # (TB, 1)
    sent_count = jnp.where(row_valid & (lengths != 0.0),
                           jnp.float32(1.0), jnp.float32(0.0))

    loss_part_ref[...] = jnp.sum(normalized).reshape(1, 1, 1)
    sents_part_ref[...] = jnp.sum(sent_count).reshape(1, 1, 1)


# ~1 MiB per input tile per pipeline buffer: saturates the HBM roofline while
# keeping 2 inputs x 2 buffers + ~3x f32 upcast temporaries far under the
# v5e 16 MiB scoped-VMEM default and v7x 64 MiB physical VMEM.
_INPUT_TILE_BYTES = 1 << 20
_MAX_BLOCK_ROWS = 1024


def _pick_block_rows(B, S, itemsize):
    rows = _INPUT_TILE_BYTES // max(1, S * itemsize)
    rows = min(rows, _MAX_BLOCK_ROWS)
    rows = max(8, (rows // 8) * 8)
    if rows >= B:
        return int(B)          # single tile spanning the whole (small) batch
    return int(rows)


def l1_depth_loss(predictions, label_batch, length_batch,
                  mask_max_value=-1, block_rows=None):
    """Pallas implementation of L1DepthLoss.forward.

    Args:
      predictions:  (B, S) predicted depths (f32 or bf16)
      label_batch:  (B, S) true depths (mask_max_value marks padding)
      length_batch: (B,)   int or float sentence lengths
    Returns:
      (batch_loss, total_sents) as float32 scalars.
    """
    B, S = predictions.shape
    itemsize = max(jnp.dtype(predictions.dtype).itemsize,
                   jnp.dtype(label_batch.dtype).itemsize)

    if block_rows is None:
        tb = _pick_block_rows(B, S, itemsize)
    else:
        tb = int(block_rows)
        tb = int(B) if tb >= B else max(8, (tb // 8) * 8)

    num_tiles = int(pl.cdiv(B, tb))
    lengths_f = length_batch.astype(jnp.float32).reshape(B, 1)

    kernel = functools.partial(
        _l1_depth_loss_kernel,
        mask_value=float(mask_max_value),
        batch_size=int(B),
        block_rows=int(tb),
    )

    loss_parts, sents_parts = pl.pallas_call(
        kernel,
        out_shape=(
            jax.ShapeDtypeStruct((num_tiles, 1, 1), jnp.float32),
            jax.ShapeDtypeStruct((num_tiles, 1, 1), jnp.float32),
        ),
        grid=(num_tiles,),
        in_specs=[
            pl.BlockSpec((tb, S), lambda i: (i, 0)),
            pl.BlockSpec((tb, S), lambda i: (i, 0)),
            pl.BlockSpec((tb, 1), lambda i: (i, 0)),
        ],
        out_specs=(
            pl.BlockSpec((1, 1, 1), lambda i: (i, 0, 0)),
            pl.BlockSpec((1, 1, 1), lambda i: (i, 0, 0)),
        ),
        compiler_params=pltpu.CompilerParams(
            dimension_semantics=("parallel",)),
    )(predictions, label_batch, lengths_f)

    total_sents = jnp.sum(sents_parts)
    loss_sum = jnp.sum(loss_parts)
    batch_loss = jnp.where(total_sents > 0.0, loss_sum / total_sents,
                           jnp.float32(0.0))
    return batch_loss, total_sents


def _reference(predictions, label_batch, length_batch, mask_max_value=-1):
    """Pure-JAX reference replicating the PyTorch semantics."""
    predictions = predictions.astype(jnp.float32)
    label_batch = label_batch.astype(jnp.float32)
    total_sents = jnp.sum(length_batch != 0).astype(jnp.float32)
    labels_1s = (label_batch > mask_max_value).astype(jnp.float32)
    pm = predictions * labels_1s
    lm = label_batch * labels_1s
    loss_per_sent = jnp.sum(jnp.abs(pm - lm), axis=1)
    normalized = loss_per_sent / length_batch.astype(jnp.float32)
    batch_loss = jnp.where(total_sents > 0,
                           jnp.sum(normalized) / total_sents, 0.0)
    return batch_loss, total_sents


def _make_inputs(key, B, S):
    k1, k2, k3 = jax.random.split(key, 3)
    predictions = jax.random.normal(k1, (B, S), dtype=jnp.float32)
    length_batch = jax.random.randint(k3, (B,), 1, S + 1).astype(jnp.int32)
    depths = jnp.abs(jax.random.normal(k2, (B, S), dtype=jnp.float32)) * 3.0
    pos = jnp.arange(S)[None, :]
    valid = pos < length_batch[:, None]
    label_batch = jnp.where(valid, depths, jnp.float32(-1.0))
    return predictions, label_batch, length_batch


if __name__ == "__main__":
    key = jax.random.PRNGKey(0)
    k_a, k_b = jax.random.split(key)

    # Test 1: small batch, single tile (B=8, S=16).
    preds, labels, lens = _make_inputs(k_a, 8, 16)
    loss, total_sents = jax.block_until_ready(
        l1_depth_loss(preds, labels, lens))
    ref_loss, ref_sents = _reference(preds, labels, lens)
    assert jnp.allclose(loss, ref_loss, rtol=1e-5, atol=1e-5), (loss, ref_loss)
    assert jnp.allclose(total_sents, ref_sents), (total_sents, ref_sents)

    # Test 2: batch grid + ragged last tile, no padding (B=37, tb=8 -> 5 steps).
    preds2, labels2, lens2 = _make_inputs(k_b, 37, 16)
    loss2, sents2 = jax.block_until_ready(
        l1_depth_loss(preds2, labels2, lens2, block_rows=8))
    ref_loss2, ref_sents2 = _reference(preds2, labels2, lens2)
    assert jnp.allclose(loss2, ref_loss2, rtol=1e-5, atol=1e-5), (loss2,
                                                                  ref_loss2)
    assert jnp.allclose(sents2, ref_sents2), (sents2, ref_sents2)

    # Test 3: default tile picker with B not a multiple of 8 (tb == B path).
    loss3, sents3 = jax.block_until_ready(
        l1_depth_loss(preds2, labels2, lens2))
    assert jnp.allclose(loss3, ref_loss2, rtol=1e-5, atol=1e-5), (loss3,
                                                                  ref_loss2)
    assert jnp.allclose(sents3, ref_sents2), (sents3, ref_sents2)

    print("KERNEL_OK")
</pallas_src>

<mosaic_0001>
module attributes {stable_mosaic.version = 11 : i64} {
  func.func @_l1_depth_loss_kernel(%arg0: i32, %arg1: memref<8x16xf32, #tpu.memory_space<vmem>>, %arg2: memref<8x16xf32, #tpu.memory_space<vmem>>, %arg3: memref<8x1xf32, #tpu.memory_space<vmem>>, %arg4: memref<1x1x1xf32, #tpu.memory_space<vmem>>, %arg5: memref<1x1x1xf32, #tpu.memory_space<vmem>>) attributes {dimension_semantics = [#tpu.dimension_semantics<parallel>], iteration_bounds = array<i64: 1>, scalar_prefetch = 0 : i64, scratch_operands = 0 : i64, tpu.core_type = #tpu.core_type<tc>, window_params = [{transform_indices = @transform_0, window_bounds = array<i64: 8, 16>}, {transform_indices = @transform_1, window_bounds = array<i64: 8, 16>}, {transform_indices = @transform_2, window_bounds = array<i64: 8, 1>}, {transform_indices = @transform_3, window_bounds = array<i64: 1, 1, 1>}, {transform_indices = @transform_4, window_bounds = array<i64: 1, 1, 1>}]} {
    %c0 = arith.constant 0 : index
    %c0_0 = arith.constant 0 : index
    %0 = vector.load %arg1[%c0, %c0_0] : memref<8x16xf32, #tpu.memory_space<vmem>>, vector<8x16xf32>
    %c0_1 = arith.constant 0 : index
    %c0_2 = arith.constant 0 : index
    %1 = vector.load %arg2[%c0_1, %c0_2] : memref<8x16xf32, #tpu.memory_space<vmem>>, vector<8x16xf32>
    %c0_3 = arith.constant 0 : index
    %c0_4 = arith.constant 0 : index
    %2 = vector.load %arg3[%c0_3, %c0_4] : memref<8x1xf32, #tpu.memory_space<vmem>>, vector<8x1xf32>
    %c8_i32 = arith.constant 8 : i32
    %3 = arith.muli %arg0, %c8_i32 : i32
    %4 = tpu.iota {dimensions = array<i32: 0>} : vector<8x1xi32>
    %5 = vector.broadcast %3 : i32 to vector<8x1xi32>
    %6 = arith.addi %5, %4 : vector<8x1xi32>
    %c8_i32_5 = arith.constant 8 : i32
    %7 = vector.broadcast %c8_i32_5 : i32 to vector<8x1xi32>
    %8 = arith.cmpi slt, %6, %7 : vector<8x1xi32>
    %cst = arith.constant -1.000000e+00 : f32
    %9 = vector.broadcast %cst : f32 to vector<8x16xf32>
    %10 = arith.cmpf ogt, %1, %9 : vector<8x16xf32>
    %11 = arith.subf %0, %1 : vector<8x16xf32>
    %12 = math.absf %11 : vector<8x16xf32>
    %cst_6 = arith.constant 0.000000e+00 : f32
    %13 = vector.broadcast %cst_6 : f32 to vector<8x16xf32>
    %14 = arith.select %10, %12, %13 : vector<8x16xi1>, vector<8x16xf32>
    %cst_7 = arith.constant dense<0.000000e+00> : vector<8xf32>
    %15 = vector.multi_reduction <add>, %14, %cst_7 [1] : vector<8x16xf32> to vector<8xf32>
    %16 = vector.shape_cast %15 : vector<8xf32> to vector<8x1xf32>
    %17 = arith.divf %16, %2 : vector<8x1xf32>
    %cst_8 = arith.constant 0.000000e+00 : f32
    %18 = vector.broadcast %cst_8 : f32 to vector<8x1xf32>
    %19 = arith.select %8, %17, %18 : vector<8x1xi1>, vector<8x1xf32>
    %cst_9 = arith.constant 0.000000e+00 : f32
    %20 = vector.broadcast %cst_9 : f32 to vector<8x1xf32>
    %21 = arith.cmpf one, %2, %20 : vector<8x1xf32>
    %22 = arith.andi %8, %21 : vector<8x1xi1>
    %cst_10 = arith.constant 1.000000e+00 : f32
    %cst_11 = arith.constant 0.000000e+00 : f32
    %23 = vector.broadcast %cst_10 : f32 to vector<8x1xf32>
    %24 = vector.broadcast %cst_11 : f32 to vector<8x1xf32>
    %25 = arith.select %22, %23, %24 : vector<8x1xi1>, vector<8x1xf32>
    %26 = vector.shape_cast %19 : vector<8x1xf32> to vector<1x8x1xf32>
    %cst_12 = arith.constant dense<0.000000e+00> : vector<1xf32>
    %27 = vector.multi_reduction <add>, %26, %cst_12 [1, 2] : vector<1x8x1xf32> to vector<1xf32>
    %28 = vector.shape_cast %27 : vector<1xf32> to vector<1x1x1xf32>
    %29 = vector.extract %28[0, 0, 0] : f32 from vector<1x1x1xf32>
    %30 = vector.broadcast %29 : f32 to vector<1x1x1xf32>
    %c0_13 = arith.constant 0 : index
    %c0_14 = arith.constant 0 : index
    %c0_15 = arith.constant 0 : index
    %31 = vector.load %arg4[%c0_13, %c0_14, %c0_15] : memref<1x1x1xf32, #tpu.memory_space<vmem>>, vector<1x1x1xf32>
    tpu.vector_store %arg4[%c0_13, %c0_14, %c0_15], %30 {strides = array<i32>} : memref<1x1x1xf32, #tpu.memory_space<vmem>>, vector<1x1x1xf32>,
    %32 = vector.shape_cast %25 : vector<8x1xf32> to vector<1x8x1xf32>
    %cst_16 = arith.constant dense<0.000000e+00> : vector<1xf32>
    %33 = vector.multi_reduction <add>, %32, %cst_16 [1, 2] : vector<1x8x1xf32> to vector<1xf32>
    %34 = vector.shape_cast %33 : vector<1xf32> to vector<1x1x1xf32>
    %35 = vector.extract %34[0, 0, 0] : f32 from vector<1x1x1xf32>
    %36 = vector.broadcast %35 : f32 to vector<1x1x1xf32>
    %c0_17 = arith.constant 0 : index
    %c0_18 = arith.constant 0 : index
    %c0_19 = arith.constant 0 : index
    %37 = vector.load %arg5[%c0_17, %c0_18, %c0_19] : memref<1x1x1xf32, #tpu.memory_space<vmem>>, vector<1x1x1xf32>
    tpu.vector_store %arg5[%c0_17, %c0_18, %c0_19], %36 {strides = array<i32>} : memref<1x1x1xf32, #tpu.memory_space<vmem>>, vector<1x1x1xf32>,
    return
  }
  func.func @transform_0(%arg0: i32) -> (i32, i32) {
    %c0_i32 = arith.constant 0 : i32
    %c0_i32_0 = arith.constant 0 : i32
    return %arg0, %c0_i32 : i32, i32
  }
  func.func @transform_1(%arg0: i32) -> (i32, i32) {
    %c0_i32 = arith.constant 0 : i32
    %c0_i32_0 = arith.constant 0 : i32
    return %arg0, %c0_i32 : i32, i32
  }
  func.func @transform_2(%arg0: i32) -> (i32, i32) {
    %c0_i32 = arith.constant 0 : i32
    %c0_i32_0 = arith.constant 0 : i32
    return %arg0, %c0_i32 : i32, i32
  }
  func.func @transform_3(%arg0: i32) -> (i32, i32, i32) {
    %c0_i32 = arith.constant 0 : i32
    %c0_i32_0 = arith.constant 0 : i32
    %c0_i32_1 = arith.constant 0 : i32
    return %arg0, %c0_i32, %c0_i32_0 : i32, i32, i32
  }
  func.func @transform_4(%arg0: i32) -> (i32, i32, i32) {
    %c0_i32 = arith.constant 0 : i32
    %c0_i32_0 = arith.constant 0 : i32
    %c0_i32_1 = arith.constant 0 : i32
    return %arg0, %c0_i32, %c0_i32_0 : i32, i32, i32
  }
}

</mosaic_0001>

<bundles_post_ra>
// kernel: tpu_custom_call.1
= control target key start
LH: loop header
LB: loop body
LE: loop exit
PB: predicated region body
PF: predicated region fallthrough
CT: control target
= control target key end

     0   :  { %10 = vsyncpa [#allocation3], 0  ;;  %s261_s0 = inlined_call_operand.vmem [shape: f32[8,16], index: 0, kind: input, shape index: {}]   ;;  %s262_s1 = inlined_call_operand.hbm [shape: f32[8,16], index: 1, kind: input, shape index: {}]   ;;  %s263_s2 = inlined_call_operand.vmem [shape: f32[8,1], index: 2, kind: input, shape index: {}]   ;;  %s264_s3 = inlined_call_operand.hbm [shape: f32[1,1,1], index: 3, kind: output, shape index: {0}]   ;;  %s265_s4 = inlined_call_operand.hbm [shape: f32[1,1,1], index: 4, kind: output, shape index: {1}]  }
   0x1   :  { %11 = vsyncpa [#allocation4], 0 }
   0x2   :  { %12 = vsyncpa [#allocation7], 0  ;;  %s20_s17 = sshll.u32 %s262_s1, 4  ;;  %s215_s18 = smov [#allocation2]   ;;  %s21_s17 = int_to_ptr.hbm [resolvable:$true] %s20_s17 }
   0x3   :  { %s22_s19 = sshll.u32 %s215_s18, 4  ;;  %s23_s19 = int_to_ptr.vmem [resolvable:$true] %s22_s19 }
   0x4   :  { %25 = dma.hbm_to_vmem [thread:$0]  %s21_s17, 128, %s23_s19, [#allocation3]  }
   0x5   :  { %209 = dma.done.wait [#allocation3], 128  }
   0x6   :  { %210 = vsyncadd [#allocation3], 4294967168  ;;  %v32_v0 = vld [vmem:[%s261_s0] sm:$0xff]  ;;  %vm68_vm0 = vcmask 7168   ;;  %v216_v4 = vmov 0.0   ;;  %vm45_vm3 = vcmask 130048  }
   0x7   :  { %v33_v1 = vld [vmem:[#allocation2] sm:$0xff]  ;;  %s217_s0 = smov [#allocation5]   ;;  %s101_s25 = sshll.u32 %s264_s3, 4  ;;  %vm80_vm8 = vcmask 0   ;;  %s102_s25 = int_to_ptr.hbm [resolvable:$true] %s101_s25 }
   0x8   :  { %v34_v2 = vld [vmem:[%s263_s2] sm:$0xff]  ;;  %v42_v3 = vsub.f32 %v32_v0, %v33_v1  ;;  %vm41_vm2 = vcmp.gt.f32.partialorder %v33_v1, -1.0  ;;  %s99_s1 = sshll.u32 %s217_s0, 4  ;;  %s218_s26 = smov [#allocation6]   ;;  %s100_s1 = int_to_ptr.vmem [resolvable:$true] %s99_s1 }
   0x9   :  { %vm65_vm1 = vcmp.ne.f32.partialorder %v34_v2, 0.0  ;;  %135 = vrcp.f32 %v34_v2  ;;  %vm54_vm4 = vweird.f32 %v34_v2  ;;  %v60_v14 = vand.u32 2147483648, %v34_v2  ;;  %s110_s27 = sshll.u32 %s218_s26, 4  ;;  %s112_s30 = sshll.u32 %s265_s4, 4  ;;  %s111_s27 = int_to_ptr.vmem [resolvable:$true] %s110_s27  ;;  %s113_s30 = int_to_ptr.hbm [resolvable:$true] %s112_s30 }
   0xa   :  { %v67_v5 = vsel %vm65_vm1, 1.0, %v216_v4  ;;  %v43_v6 = vand.u32 2147483647, %v42_v3  ;;  %v58_v16 = vand.u32 2147483647, %v34_v2 }
   0xb   :  { %v82_v7 = vsel %vm68_vm0, %v67_v5, 0.0  ;;  %v61_v17 = vor.u32 1.1754944e-38, %v60_v14 }
   0xc   :  { %83 = vadd.xlane.f32.xlu1 %v82_v7  ;;  %v44_v8 = vsel %vm41_vm2, %v43_v6, 0.0  ;;  %vm59_vm7 = vcmp.eq.f32.partialorder %v58_v16, 8.507059e+37 }
   0xd   :  { %v46_v9 = vsel %vm45_vm3, %v44_v8, 0.0 }
   0xe   :  { %47 = vadd.xlane.f32.xlu0 %v46_v9 }
   0xf   :  { %v136_v10 = vpop.eup %135 }
  0x10   :  { %v50_v11 = vmul.f32 %v136_v10, %v34_v2  ;;  %vm55_vm5 = vweird.f32 %v136_v10 }
  0x11   :  { %vm56_vm6 = vmor %vm54_vm4, %vm55_vm5 }
  0x12   :  { %v51_v12 = vsub.f32 1.0, %v50_v11 }
  0x14   :  { %v52_v13 = vmul.f32 %v136_v10, %v51_v12 }
  0x16   :  { %v53_v15 = vadd.f32 %v136_v10, %v52_v13 }
  0x18   :  { %v57_v18 = vsel %vm56_vm6, %v136_v10, %v53_v15 }
  0x19   :  { %v62_v19 = vsel %vm59_vm7, %v61_v17, %v57_v18 }
  0x7f   :  { %v84_v23 = vpop.xlane.xlu1 %83 }
  0x80   :  { %v85_v24 = vrot.slane %v84_v23, 4 }
  0x81   :  { %v48_v20 = vpop.xlane.xlu0 %47 }
  0x82   :  { %v63_v21 = vmul.f32 %v62_v19, %v48_v20  ;;  %v86_v25 = vadd.f32 %v85_v24, %v84_v23 }
  0x84   :  { %v69_v22 = vsel %vm68_vm0, %v63_v21, 0.0  ;;  %v87_v26 = vrot.slane %v86_v25, 2 }
  0x85   :  { %70 = vadd.xlane.f32.xlu0 %v69_v22 }
  0x86   :  { %v88_v30 = vadd.f32 %v87_v26, %v86_v25 }
  0x88   :  { %v89_v33 = vrot.slane %v88_v30, 1 }
  0x8a   :  { %v90_v36 = vadd.f32 %v89_v33, %v88_v30 }
  0xf8   :  { %v71_v27 = vpop.xlane.xlu0 %70 }
  0xf9   :  { %v72_v28 = vrot.slane %v71_v27, 4 }
  0xfb   :  { %v73_v29 = vadd.f32 %v72_v28, %v71_v27 }
  0xfd   :  { %v74_v31 = vrot.slane %v73_v29, 2 }
  0xff   :  { %v75_v32 = vadd.f32 %v74_v31, %v73_v29 }
 0x101   :  { %v76_v34 = vrot.slane %v75_v32, 1 }
 0x103   :  { %v77_v35 = vadd.f32 %v76_v34, %v75_v32 }
 0x105   :  { %127 = vpush %v77_v35 }
 0x106   :  { %129 = vpush %v90_v36 }
 0x136   :  { %s128_s5 = spop %127 }
 0x137   :  { %v79_v37 = vstv %s128_s5  ;;  %s130_s6 = spop %129 }
 0x138   :  { %81 = vst.msk [vmem:[#allocation5] sm:$0x1] %vm80_vm8, %v79_v37  ;;  %v92_v38 = vstv %s130_s6 }
 0x139   :  { %93 = vst.msk [vmem:[#allocation6] sm:$0x1] %vm80_vm8, %v92_v38  ;;  %104 = dma.vmem_to_hbm [thread:$0]  %s100_s1, 16, %s102_s25, [#allocation4]  }
 0x13a   :  { %115 = dma.vmem_to_hbm [thread:$0]  %s111_s27, 16, %s113_s30, [#allocation7]  }
 0x13b   :  { %211 = dma.done.wait [#allocation4], 16  }
 0x13c   :  { %212 = vsyncadd [#allocation4], 4294967280 }
 0x13d   :  { %213 = dma.done.wait [#allocation7], 16  }
 0x13e   :  { %214 = vsyncadd [#allocation7], 4294967280 }
 0x13f   :  { %124 = vsyncpa [#allocation3], 1 }
 0x140   :  { %125 = vsyncpa [#allocation4], 1 }
 0x141   :  { %126 = vsyncpa [#allocation7], 1 }

</bundles_post_ra>
